<compile_context>
chip_gen: v7x
topology: tpu7x:2x2x1
jax: 0.10.0
libtpu: 0.0.40
codegen_flags: <defaults>
</compile_context>

<pallas_src>
import jax
import jax.numpy as jnp
import numpy as np
from jax.experimental import pallas as pl
from jax.experimental.pallas import tpu as pltpu


# ----------------------------- Pallas kernel ------------------------------ #
def shift_kernel(w_ref, x_ref, o_ref):
    # x_ref / o_ref: (T, C, HW_tile)   (batch dim squeezed away by BlockSpec)
    # w_ref:         (3, C, 1)         w_ref[k, ch, 0] = conv.weight[ch, 0, k]
    x = x_ref[...]                       # (T, C, HW)
    w = w_ref[...]                       # (3, C, 1)
    t = x.shape[0]

    w0 = w[0][None]                      # (1, C, 1) -> broadcast over (T,C,HW)
    w1 = w[1][None]
    w2 = w[2][None]

    # PyTorch Conv1d (cross-correlation, padding=1):
    #   out[t] = w0*x[t-1] + w1*x[t] + w2*x[t+1]   (zero padded at the borders)
    o_ref[...] = w1 * x
    if t > 1:
        # shift along the leading (non-tiled) T axis; accumulate in place.
        o_ref[pl.ds(1, t - 1), :, :] += w0 * x[: t - 1]
        o_ref[pl.ds(0, t - 1), :, :] += w2 * x[1:]


# ----------------------------- tiling helper ------------------------------ #
def _pick_tile_hw(hw, c, t, itemsize,
                  max_block_bytes=2 * 1024 * 1024, max_lanes=2048):
    """Largest multiple of 128 dividing hw with block <= max_block_bytes."""
    if hw % 128 != 0:
        # Block must equal the full dim to stay legal; no spatial tiling.
        return hw
    bytes_per_lane = t * c * itemsize
    budget_lanes = max(128, max_block_bytes // bytes_per_lane)
    budget_lanes = min(budget_lanes, max_lanes, hw)
    cand = (budget_lanes // 128) * 128
    while cand >= 128:
        if hw % cand == 0:
            return cand
        cand -= 128
    return 128


# ------------------------------ JAX wrapper ------------------------------- #
def shift_module_forward(x, conv_weight, n_segment, tile_hw=None):
    """x: (nt, c, h, w), conv_weight: (c, 1, 3)."""
    nt, c, h, w = x.shape
    assert nt % n_segment == 0, "nt must be a multiple of n_segment"
    nb = nt // n_segment
    hw = h * w
    itemsize = jnp.dtype(x.dtype).itemsize

    # Pure reshapes (no HBM data movement): NCHW -> (nb, T, C, H*W)
    xk = x.reshape(nb, n_segment, c, hw)
    # (c, 1, 3) -> (3, c, 1): one tap per leading index, per-channel on
    # sublanes, broadcast along lanes inside the kernel.
    wk = conv_weight[:, 0, :].T.reshape(3, c, 1)

    if tile_hw is None:
        tile_hw = _pick_tile_hw(hw, c, n_segment, itemsize)
    n_hw_tiles = hw // tile_hw

    block_bytes = n_segment * c * tile_hw * itemsize
    # in + out, double buffered, plus headroom for the tiny weight tile.
    vmem_limit = int(min(48 * 2**20, max(16 * 2**20, 4 * block_bytes + (2 << 20))))

    # TODO(synk): optional bf16 storage (f32 accumulate) would halve HBM bytes
    # if the surrounding model tolerates it.
    out = pl.pallas_call(
        shift_kernel,
        out_shape=jax.ShapeDtypeStruct((nb, n_segment, c, hw), x.dtype),
        grid_spec=pltpu.PrefetchScalarGridSpec(
            num_scalar_prefetch=0,
            grid=(nb, n_hw_tiles),
            in_specs=[
                pl.BlockSpec((3, c, 1), lambda b, j: (0, 0, 0)),
                pl.BlockSpec((pl.Squeezed(), n_segment, c, tile_hw),
                             lambda b, j: (b, 0, 0, j)),
            ],
            out_specs=pl.BlockSpec((pl.Squeezed(), n_segment, c, tile_hw),
                                   lambda b, j: (b, 0, 0, j)),
        ),
        compiler_params=pltpu.CompilerParams(
            dimension_semantics=("parallel", "parallel"),
            vmem_limit_bytes=vmem_limit,
        ),
    )(wk, xk)

    # Pure reshape back: (nb, T, C, H*W) -> (nt, c, h, w)
    return out.reshape(nt, c, h, w)


# ------------------- deterministic parameter construction ----------------- #
def make_shift_weight(input_channels, n_div=8, mode='shift'):
    """Replicates ShiftModule.__init__ weight init. Shape: (c, 1, 3)."""
    fold = input_channels // n_div
    wgt = jnp.zeros((input_channels, 1, 3), jnp.float32)
    if mode == 'shift':
        wgt = wgt.at[:fold, 0, 2].set(1.0)
        wgt = wgt.at[fold:, 0, 1].set(1.0)
        wgt = wgt.at[-fold:, 0, 0].set(1.0)
        wgt = wgt.at[-fold:, 0, 1].set(0.0)
    elif mode == 'shift_left':
        wgt = wgt.at[:2 * fold, 0, 2].set(1.0)
        wgt = wgt.at[2 * fold:, 0, 1].set(1.0)
        wgt = jnp.flip(wgt, axis=(0, 1))
    elif mode == 'shift_right':
        wgt = wgt.at[:2 * fold, 0, 0].set(1.0)
        wgt = wgt.at[2 * fold:, 0, 1].set(1.0)
    return wgt


# ------------------------------ pure-JAX ref ------------------------------ #
def ref_forward(x, conv_weight, n_segment):
    nt, c, h, w = x.shape
    nb = nt // n_segment
    xv = x.reshape(nb, n_segment, c, h, w)
    xp = jnp.pad(xv, ((0, 0), (1, 1), (0, 0), (0, 0), (0, 0)))
    w0 = conv_weight[:, 0, 0][None, None, :, None, None]
    w1 = conv_weight[:, 0, 1][None, None, :, None, None]
    w2 = conv_weight[:, 0, 2][None, None, :, None, None]
    out = w0 * xp[:, :-2] + w1 * xp[:, 1:-1] + w2 * xp[:, 2:]
    return out.reshape(nt, c, h, w)


if __name__ == "__main__":
    n_segment = 8
    n_div = 8
    c, h, w = 8, 16, 16                 # H*W = 256 (lane-dense, 2x128)
    n_batch = 2
    nt = n_batch * n_segment            # 16

    key = jax.random.PRNGKey(0)
    x = jax.random.normal(key, (nt, c, h, w), dtype=jnp.float32)
    weight = make_shift_weight(c, n_div=n_div, mode='shift')

    out = shift_module_forward(x, weight, n_segment)
    out = jax.block_until_ready(out)

    ref = ref_forward(x, weight, n_segment)
    np.testing.assert_allclose(np.asarray(out), np.asarray(ref),
                               rtol=1e-5, atol=1e-5)
    print("KERNEL_OK")
</pallas_src>

<mosaic_0001>
module attributes {stable_mosaic.version = 11 : i64} {
  func.func @shift_kernel(%arg0: i32, %arg1: i32, %arg2: memref<3x8x1xf32, #tpu.memory_space<vmem>>, %arg3: memref<1x8x8x256xf32, #tpu.memory_space<vmem>>, %arg4: memref<1x8x8x256xf32, #tpu.memory_space<vmem>>) attributes {dimension_semantics = [#tpu.dimension_semantics<parallel>, #tpu.dimension_semantics<parallel>], iteration_bounds = array<i64: 2, 1>, scalar_prefetch = 0 : i64, scratch_operands = 0 : i64, tpu.core_type = #tpu.core_type<tc>, window_params = [{pipeline_mode = #tpu.pipeline_mode<synchronous>, transform_indices = @transform_0, window_bounds = array<i64: 3, 8, 1>}, {transform_indices = @transform_1, window_bounds = array<i64: 1, 8, 8, 256>}, {transform_indices = @transform_2, window_bounds = array<i64: 1, 8, 8, 256>}]} {
    %c0 = arith.constant 0 : index
    %c0_0 = arith.constant 0 : index
    %c0_1 = arith.constant 0 : index
    %c0_2 = arith.constant 0 : index
    %0 = vector.load %arg3[%c0, %c0_0, %c0_1, %c0_2] : memref<1x8x8x256xf32, #tpu.memory_space<vmem>>, vector<1x8x8x256xf32>
    %1 = vector.shape_cast %0 : vector<1x8x8x256xf32> to vector<8x8x256xf32>
    %c0_3 = arith.constant 0 : index
    %c0_4 = arith.constant 0 : index
    %c0_5 = arith.constant 0 : index
    %2 = vector.load %arg2[%c0_3, %c0_4, %c0_5] : memref<3x8x1xf32, #tpu.memory_space<vmem>>, vector<3x8x1xf32>
    %3 = vector.extract_strided_slice %2 {offsets = [0, 0, 0], sizes = [1, 8, 1], strides = [1, 1, 1]} : vector<3x8x1xf32> to vector<1x8x1xf32>
    %4 = vector.shape_cast %3 : vector<1x8x1xf32> to vector<8x1xf32>
    %5 = vector.shape_cast %4 : vector<8x1xf32> to vector<1x8x1xf32>
    %6 = vector.extract_strided_slice %2 {offsets = [1, 0, 0], sizes = [1, 8, 1], strides = [1, 1, 1]} : vector<3x8x1xf32> to vector<1x8x1xf32>
    %7 = vector.shape_cast %6 : vector<1x8x1xf32> to vector<8x1xf32>
    %8 = vector.shape_cast %7 : vector<8x1xf32> to vector<1x8x1xf32>
    %9 = vector.extract_strided_slice %2 {offsets = [2, 0, 0], sizes = [1, 8, 1], strides = [1, 1, 1]} : vector<3x8x1xf32> to vector<1x8x1xf32>
    %10 = vector.shape_cast %9 : vector<1x8x1xf32> to vector<8x1xf32>
    %11 = vector.shape_cast %10 : vector<8x1xf32> to vector<1x8x1xf32>
    %12 = vector.broadcast %8 : vector<1x8x1xf32> to vector<8x8x256xf32>
    %13 = arith.mulf %12, %1 : vector<8x8x256xf32>
    %c0_6 = arith.constant 0 : index
    %c0_7 = arith.constant 0 : index
    %c0_8 = arith.constant 0 : index
    %c0_9 = arith.constant 0 : index
    %14 = vector.load %arg4[%c0_6, %c0_7, %c0_8, %c0_9] : memref<1x8x8x256xf32, #tpu.memory_space<vmem>>, vector<1x8x8x256xf32>
    %15 = vector.shape_cast %14 : vector<1x8x8x256xf32> to vector<8x8x256xf32>
    %16 = vector.shape_cast %13 : vector<8x8x256xf32> to vector<1x8x8x256xf32>
    tpu.vector_store %arg4[%c0_6, %c0_7, %c0_8, %c0_9], %16 {strides = array<i32>} : memref<1x8x8x256xf32, #tpu.memory_space<vmem>>, vector<1x8x8x256xf32>,
    %c0_10 = arith.constant 0 : index
    %c1 = arith.constant 1 : index
    %c0_11 = arith.constant 0 : index
    %c0_12 = arith.constant 0 : index
    %17 = vector.load %arg4[%c0_10, %c1, %c0_11, %c0_12] : memref<1x8x8x256xf32, #tpu.memory_space<vmem>>, vector<1x7x8x256xf32>
    %18 = vector.shape_cast %17 : vector<1x7x8x256xf32> to vector<7x8x256xf32>
    %19 = vector.extract_strided_slice %1 {offsets = [0, 0, 0], sizes = [7, 8, 256], strides = [1, 1, 1]} : vector<8x8x256xf32> to vector<7x8x256xf32>
    %20 = vector.broadcast %5 : vector<1x8x1xf32> to vector<7x8x256xf32>
    %21 = arith.mulf %20, %19 : vector<7x8x256xf32>
    %22 = arith.addf %18, %21 : vector<7x8x256xf32>
    %c0_13 = arith.constant 0 : index
    %c1_14 = arith.constant 1 : index
    %c0_15 = arith.constant 0 : index
    %c0_16 = arith.constant 0 : index
    %23 = vector.load %arg4[%c0_13, %c1_14, %c0_15, %c0_16] : memref<1x8x8x256xf32, #tpu.memory_space<vmem>>, vector<1x7x8x256xf32>
    %24 = vector.shape_cast %23 : vector<1x7x8x256xf32> to vector<7x8x256xf32>
    %25 = vector.shape_cast %22 : vector<7x8x256xf32> to vector<1x7x8x256xf32>
    tpu.vector_store %arg4[%c0_13, %c1_14, %c0_15, %c0_16], %25 {strides = array<i32>} : memref<1x8x8x256xf32, #tpu.memory_space<vmem>>, vector<1x7x8x256xf32>,
    %c0_17 = arith.constant 0 : index
    %c0_18 = arith.constant 0 : index
    %c0_19 = arith.constant 0 : index
    %c0_20 = arith.constant 0 : index
    %26 = vector.load %arg4[%c0_17, %c0_18, %c0_19, %c0_20] : memref<1x8x8x256xf32, #tpu.memory_space<vmem>>, vector<1x7x8x256xf32>
    %27 = vector.shape_cast %26 : vector<1x7x8x256xf32> to vector<7x8x256xf32>
    %28 = vector.extract_strided_slice %1 {offsets = [1, 0, 0], sizes = [7, 8, 256], strides = [1, 1, 1]} : vector<8x8x256xf32> to vector<7x8x256xf32>
    %29 = vector.broadcast %11 : vector<1x8x1xf32> to vector<7x8x256xf32>
    %30 = arith.mulf %29, %28 : vector<7x8x256xf32>
    %31 = arith.addf %27, %30 : vector<7x8x256xf32>
    %c0_21 = arith.constant 0 : index
    %c0_22 = arith.constant 0 : index
    %c0_23 = arith.constant 0 : index
    %c0_24 = arith.constant 0 : index
    %32 = vector.load %arg4[%c0_21, %c0_22, %c0_23, %c0_24] : memref<1x8x8x256xf32, #tpu.memory_space<vmem>>, vector<1x7x8x256xf32>
    %33 = vector.shape_cast %32 : vector<1x7x8x256xf32> to vector<7x8x256xf32>
    %34 = vector.shape_cast %31 : vector<7x8x256xf32> to vector<1x7x8x256xf32>
    tpu.vector_store %arg4[%c0_21, %c0_22, %c0_23, %c0_24], %34 {strides = array<i32>} : memref<1x8x8x256xf32, #tpu.memory_space<vmem>>, vector<1x7x8x256xf32>,
    return
  }
  func.func @transform_0(%arg0: i32, %arg1: i32) -> (i32, i32, i32) {
    %c0_i32 = arith.constant 0 : i32
    %c0_i32_0 = arith.constant 0 : i32
    %c0_i32_1 = arith.constant 0 : i32
    %c0_i32_2 = arith.constant 0 : i32
    return %c0_i32, %c0_i32_0, %c0_i32_1 : i32, i32, i32
  }
  func.func @transform_1(%arg0: i32, %arg1: i32) -> (i32, i32, i32, i32) {
    %c0_i32 = arith.constant 0 : i32
    %c0_i32_0 = arith.constant 0 : i32
    %c0_i32_1 = arith.constant 0 : i32
    return %arg0, %c0_i32, %c0_i32_0, %arg1 : i32, i32, i32, i32
  }
  func.func @transform_2(%arg0: i32, %arg1: i32) -> (i32, i32, i32, i32) {
    %c0_i32 = arith.constant 0 : i32
    %c0_i32_0 = arith.constant 0 : i32
    %c0_i32_1 = arith.constant 0 : i32
    return %arg0, %c0_i32, %c0_i32_0, %arg1 : i32, i32, i32, i32
  }
}

</mosaic_0001>

<bundles_post_ra>
// kernel: tpu_custom_call.1
= control target key start
LH: loop header
LB: loop body
LE: loop exit
PB: predicated region body
PF: predicated region fallthrough
CT: control target
= control target key end

     0   :  { %7 = vsyncpa [#allocation3], 0  ;;  %s985_s0 = inlined_call_operand.vmem [shape: f32[3,8,1], index: 0, kind: input, shape index: {}]   ;;  %s986_s1 = inlined_call_operand.hbm [shape: f32[2,8,8,256], index: 1, kind: input, shape index: {}]   ;;  %s987_s2 = inlined_call_operand.hbm [shape: f32[2,8,8,256], index: 2, kind: output, shape index: {}]  }
   0x1   :  { %9 = vsyncpa [#allocation3 + $0x1], 0 }
   0x2   :  { %10 = vsyncpa [#allocation4], 0 }
   0x3   :  { %12 = vsyncpa [#allocation4 + $0x1], 0  ;;  %s714_s9 = smov 0   ;;  %s716_s10 = smov 0  }
   0x4   :  { %s718_s11 = smov 0   ;;  %s720_s12 = smov 0  }
   0x5   :  { %s722_s13 = smov 0   ;;  %s724_s14 = smov 0  }
   0x6 LB: > { %s464_s15 = sadd.s32 4294967295, %s690_s14   ;;  %s465_s16 = sadd.s32 4294967294, %s690_s14   ;;  %s690_s14 = sphi %s724_s14, %s18_s14   ;;  %s686_s13 = sphi %s722_s13, %s1002_s13   ;;  %s682_s12 = sphi %s720_s12, %s1001_s12   ;;  %s678_s11 = sphi %s718_s11, %s1000_s11   ;;  %s674_s10 = sphi %s716_s10, %s999_s10   ;;  %s670_s9 = sphi %s714_s9, %s998_s9  }
   0x7   : > { %s30_s17 = sadd.s32 1, %s686_s13  ;;  %s60_s18 = sadd.s32 1, %s678_s11 }
   0x8   : > { %p32_p0 = scmp.ge.s32.totalorder %s30_s17, 2  ;;  %p67_p1 = scmp.ne.s32.totalorder %s678_s11, %s674_s10 }
   0x9   : > { %p68_p2 = scmp.eq.s32.totalorder %s690_s14, 0  ;;  %p73_p3 = scmp.ne.s32.totalorder %s674_s10, %s670_s9 }
   0xa   : > { %s1004_s17 = smov (%p32_p0, %s30_s17), 0  ;;  %p74_p5 = scmp.eq.s32.totalorder %s464_s15, 0 }
   0xb   : > { %p755_p4 = por %p68_p2, %p67_p1  ;;  %s55_s20 = ssub.s32 %s686_s13, %s1004_s17 }
   0xc   : > { %p99_p6 = scmp.eq.s32.totalorder %s464_s15, 1  ;;  %p58_p7 = scmp.eq.s32.totalorder %s55_s20, 0 }
   0xd   : > { %p761_p8 = por %p74_p5, %p73_p3  ;;  %p105_p10 = scmp.eq.s32.totalorder %s465_s16, 1 }
   0xe   : > { %p765_p9 = por %p99_p6, %p67_p1  ;;  %p521_p13 = scmp.lt.s32.totalorder %s690_s14, 2 }
   0xf   : > { %s770_s23 = scalar_select %p58_p7, %s678_s11, %s60_s18  }
  0x10   : > { %s991_s22 = scalar_select %p765_p9, 1, 0 }
  0x11   : > { %p772_p11 = por %p105_p10, %p73_p3  ;;  %s128_s25 = sand.u32 1, %s678_s11  }
  0x12   : > { %s468_s26 = sshll.u32 %s128_s25, 7  ;;  %s507_s27 = sshll.u32 %s686_s13, 11 }
  0x13   : > { %s992_s24 = scalar_select %p772_p11, 1, 0 }
  0x14   : > { %s783_s30 = scalar_lea.hbm %s986_s1, %s507_s27  ;;  %s132_s3 = scalar_lea.vmem [#allocation2], %s468_s26 }
  0x15   : > { %s141_s4 = sshll.u32 %s132_s3, 4  ;;  %p789_p0 = pnand %p521_p13, %p755_p4  ;;  %s785_s4 = int_to_ptr.vmem [resolvable:$true] %s141_s4 }
  0x16   : > { %s794_s6 = scalar_lea.sflag [#allocation3], %s128_s25  ;;  %s578_s7 = scalar_lea.hbm %s783_s30, 2048 }
  0x17   : > { %p579_p2 = scmp.ne.s32.totalorder %s783_s30, %s578_s7  ;;  %p580_p3 = pneg %p789_p0 }
  0x18   : > { %s583_s16 = scalar_lea.hbm %s986_s1, 4096  ;;  %p584_p4 = scmp.lt.u32.totalorder %s783_s30, %s986_s1 }
  0x19   : > { %p581_p5 = pnand %p580_p3, %p579_p2  ;;  %p585_p7 = scmp.lt.u32.totalorder %s583_s16, %s578_s7 }
  0x1a   : > { %p587_p13 = scmp.lt.u32.totalorder %s578_s7, %s783_s30 }
  0x1b   : > { %p582_p6 = pneg %p581_p5  ;;  %p586_p10 = por %p585_p7, %p584_p4 }
  0x1d   : > { %p588_p12 = por %p587_p13, %p586_p10 }
  0x1f   : > { %p589_p1 = pnand %p588_p12, %p582_p6 }
  0x21   : > { %592 = shalt.err (!%p589_p1)
}
  0x22   : > { %s593_s20 = scalar_lea.vmem %s785_s4, 2048  ;;  %s692_s25 = smov [#allocation2]  }
  0x23   : > { %p594_p2 = scmp.ne.s32.totalorder %s785_s4, %s593_s20  ;;  %s598_s26 = sshll.u32 %s692_s25, 4  ;;  %s599_s26 = int_to_ptr.vmem [resolvable:$false] %s598_s26 }
  0x24   : > { %s600_s27 = scalar_lea.vmem %s599_s26, 4096  ;;  %p601_p9 = scmp.lt.s32.totalorder %s785_s4, %s599_s26 }
  0x25   : > { %p596_p5 = pnand %p594_p2, %p580_p3  ;;  %p602_p4 = scmp.lt.s32.totalorder %s600_s27, %s593_s20 }
  0x27   : > { %p597_p11 = pneg %p596_p5  ;;  %p603_p7 = por %p602_p4, %p601_p9 }
  0x29   : > { %p604_p10 = pnand %p603_p7, %p597_p11 }
  0x2b   : > { %607 = shalt.err (!%p604_p10)
}
  0x2c   : > { %s693_s28 = smov 256   ;;  %s694_s29 = smov 16  }
  0x2d   : > { %516 = dma.hbm_to_vmem [thread:$0]  (!%p789_p0), %s783_s30, 2048, %s785_s4, %s794_s6, %s693_s28, %s693_s28, %s694_s29  }
  0x2e   : > { %p149_p12 = scmp.lt.s32.totalorder %s690_s14, 3  ;;  %p994_p1 = scmp.ge.s32.totalorder %s690_s14, 1 }
  0x30   : > { %p150_p3 = pnand %p994_p1, %p149_p12 }
  0x31   : > { %s826_s3 = sand.u32 (!%p150_p3), 1, %s674_s10  }
  0x32   : > { %153 = sbr.rel (%p150_p3) target bundleno = 226 (0xe2), region = 28  ;;  %s472_s7 = sshll.u32 (!%p150_p3), %s826_s3, 7 }
  0x33   : > { %s156_s8 = scalar_lea.sflag (!%p150_p3), [#allocation3], %s826_s3  ;;  %s832_s15 = scalar_lea.vmem (!%p150_p3), [#allocation2], %s472_s7 }
  0x39   : > { %661 = dma.done.wait (%p761_p8), %s156_s8, 2048  }
  0x3a   : > { %663 = vsyncadd (%p761_p8), %s156_s8, 4294965248  ;;  %v695_v0 = vmov 0   ;;  %v199_v1 = vld [vmem:[%s985_s0 + $0x8] sm:$0xff]  ;;  %v200_v2 = vld [vmem:[%s985_s0 + $0x10] sm:$0xff]  ;;  %s901_s18 = scalar_lea.vmem [#allocation5], %s472_s7  ;;  %s508_s19 = sshll.u32 %s682_s12, 11 }
  0x3b   : > { %576 = vset.pattern.permute.xlu0 %v695_v0  ;;  %577 = vset.pattern.permute.xlu1 %v695_v0  ;;  %v198_v3 = vld [vmem:[%s985_s0] sm:$0xff]  ;;  %v183_v5 = vld [vmem:[%s832_s15 + $0x8] sm:$0xff]  ;;  %v184_v6 = vld [vmem:[%s832_s15 + $0x10] sm:$0xff]  ;;  %s377_s20 = sshll.u32 %s901_s18, 4  ;;  %s922_s26 = scalar_lea.hbm %s987_s2, %s508_s19  ;;  %s924_s20 = int_to_ptr.vmem [resolvable:$true] %s377_s20 }
  0x3c   : > { %203 = vperm.xlu0 %576, %v199_v1   ;;  %316 = vperm.xlu1 %577, %v200_v2   ;;  %v182_v4 = vld [vmem:[%s832_s15] sm:$0xff]  ;;  %v185_v7 = vld [vmem:[%s832_s15 + $0x18] sm:$0xff]  ;;  %v187_v9 = vld [vmem:[%s832_s15 + $0x28] sm:$0xff]  ;;  %s362_s27 = scalar_lea.sflag [#allocation4], %s826_s3  ;;  %s608_s28 = scalar_lea.vmem %s924_s20, 2048 }
  0x3d   : > { %v186_v8 = vld [vmem:[%s832_s15 + $0x20] sm:$0xff]  ;;  %v854_v10 = vld [vmem:[%s832_s15 + $0x30] sm:$0xff]  ;;  %v857_v11 = vld [vmem:[%s832_s15 + $0x38] sm:$0xff]  ;;  %p609_p8 = scmp.ne.s32.totalorder %s924_s20, %s608_s28  ;;  %p995_p9 = scmp.ne.s32.totalorder %s991_s22, 0 }
  0x3e   : > { %v860_v12 = vld [vmem:[%s832_s15 + $0x40] sm:$0xff]  ;;  %v863_v13 = vld [vmem:[%s832_s15 + $0x48] sm:$0xff]  ;;  %v866_v15 = vld [vmem:[%s832_s15 + $0x50] sm:$0xff]  ;;  %s696_s29 = smov [#allocation5]  }
  0x3f   : > { %v869_v16 = vld [vmem:[%s832_s15 + $0x58] sm:$0xff]  ;;  %v872_v17 = vld [vmem:[%s832_s15 + $0x60] sm:$0xff]  ;;  %v875_v18 = vld [vmem:[%s832_s15 + $0x68] sm:$0xff]  ;;  %p610_p11 = pnand %p609_p8, %p995_p9  ;;  %s612_s7 = sshll.u32 %s696_s29, 4  ;;  %s613_s7 = int_to_ptr.vmem [resolvable:$false] %s612_s7 }
  0x40   : > { %255 = vperm.xlu0 %576, %v198_v3   ;;  %v196_v23 = vld [vmem:[%s832_s15 + $0x70] sm:$0xff]  ;;  %v197_v24 = vld [vmem:[%s832_s15 + $0x78] sm:$0xff]  ;;  %s614_s8 = scalar_lea.vmem %s613_s7, 4096  ;;  %p615_p6 = scmp.lt.s32.totalorder %s924_s20, %s613_s7 }
  0x41   : > { %p611_p0 = pneg %p610_p11  ;;  %p616_p13 = scmp.lt.s32.totalorder %s614_s8, %s608_s28 }
  0x43   : > { %p617_p2 = por %p616_p13, %p615_p6 }
  0x45   : > { %p618_p5 = pnand %p617_p2, %p611_p0 }
  0xbb   : > { %v204_v14 = vpop.permute.xlu0 %203  ;;  %v317_v58 = vpop.permute.xlu1 %316 }
  0xbc   : > { %v877_v19 = vmul.f32 %v204_v14, %v182_v4  ;;  %v879_v20 = vmul.f32 %v204_v14, %v183_v5  ;;  %v208_v21 = vmul.f32 %v204_v14, %v184_v6  ;;  %v209_v22 = vmul.f32 %v204_v14, %v185_v7 }
  0xbd   : > { %v210_v25 = vmul.f32 %v204_v14, %v186_v8  ;;  %v211_v26 = vmul.f32 %v204_v14, %v187_v9  ;;  %v212_v27 = vmul.f32 %v204_v14, %v854_v10  ;;  %v213_v28 = vmul.f32 %v204_v14, %v857_v11 }
  0xbe   : > { %v214_v29 = vmul.f32 %v204_v14, %v860_v12  ;;  %v215_v30 = vmul.f32 %v204_v14, %v863_v13  ;;  %v216_v31 = vmul.f32 %v204_v14, %v866_v15  ;;  %v217_v32 = vmul.f32 %v204_v14, %v869_v16 }
  0xbf   : > { %v256_v33 = vpop.permute.xlu0 %255  ;;  %v218_v34 = vmul.f32 %v204_v14, %v872_v17  ;;  %v219_v35 = vmul.f32 %v204_v14, %v875_v18  ;;  %v220_v36 = vmul.f32 %v204_v14, %v196_v23  ;;  %v221_v37 = vmul.f32 %v204_v14, %v197_v24 }
  0xc0   : > { %v258_v38 = vmul.f32 %v256_v33, %v182_v4  ;;  %v259_v39 = vmul.f32 %v256_v33, %v183_v5  ;;  %v260_v40 = vmul.f32 %v256_v33, %v184_v6  ;;  %v261_v41 = vmul.f32 %v256_v33, %v185_v7 }
  0xc1   : > { %v262_v42 = vmul.f32 %v256_v33, %v186_v8  ;;  %v263_v43 = vmul.f32 %v256_v33, %v187_v9  ;;  %v264_v44 = vmul.f32 %v256_v33, %v854_v10  ;;  %v265_v45 = vmul.f32 %v256_v33, %v857_v11 }
  0xc2   : > { %v266_v46 = vmul.f32 %v256_v33, %v860_v12  ;;  %v267_v47 = vmul.f32 %v256_v33, %v863_v13  ;;  %v268_v48 = vmul.f32 %v256_v33, %v866_v15  ;;  %v269_v49 = vmul.f32 %v256_v33, %v869_v16 }
  0xc3   : > { %v270_v50 = vmul.f32 %v256_v33, %v872_v17  ;;  %v271_v51 = vmul.f32 %v256_v33, %v875_v18  ;;  %v272_v52 = vadd.f32 %v258_v38, %v208_v21  ;;  %v273_v53 = vadd.f32 %v259_v39, %v209_v22 }
  0xc4   : > { %v274_v54 = vadd.f32 %v260_v40, %v210_v25  ;;  %v275_v55 = vadd.f32 %v261_v41, %v211_v26  ;;  %v276_v56 = vadd.f32 %v262_v42, %v212_v27  ;;  %v277_v57 = vadd.f32 %v263_v43, %v213_v28 }
  0xc5   : > { %v278_v59 = vadd.f32 %v264_v44, %v214_v29  ;;  %v279_v60 = vadd.f32 %v265_v45, %v215_v30  ;;  %v280_v61 = vadd.f32 %v266_v46, %v216_v31  ;;  %v281_v62 = vadd.f32 %v267_v47, %v217_v32 }
  0xc6   : > { %v282_v63 = vadd.f32 %v268_v48, %v218_v34  ;;  %v283_v0 = vadd.f32 %v269_v49, %v219_v35  ;;  %v284_v1 = vadd.f32 %v270_v50, %v220_v36  ;;  %v285_v2 = vadd.f32 %v271_v51, %v221_v37 }
  0xc7   : > { %v319_v3 = vmul.f32 %v317_v58, %v184_v6  ;;  %v320_v4 = vmul.f32 %v317_v58, %v185_v7  ;;  %v321_v5 = vmul.f32 %v317_v58, %v186_v8  ;;  %v322_v14 = vmul.f32 %v317_v58, %v187_v9 }
  0xc8   : > { %500 = vst [vmem:[%s901_s18 + $0x70] sm:$0xff] %v284_v1  ;;  %501 = vst [vmem:[%s901_s18 + $0x78] sm:$0xff] %v285_v2  ;;  %v323_v21 = vmul.f32 %v317_v58, %v854_v10  ;;  %v324_v22 = vmul.f32 %v317_v58, %v857_v11  ;;  %v325_v25 = vmul.f32 %v317_v58, %v860_v12 }
  0xc9   : > { %v326_v26 = vmul.f32 %v317_v58, %v863_v13  ;;  %v327_v6 = vmul.f32 %v317_v58, %v866_v15  ;;  %v328_v7 = vmul.f32 %v317_v58, %v869_v16  ;;  %v329_v8 = vmul.f32 %v317_v58, %v872_v17 }
  0xca   : > { %v330_v9 = vmul.f32 %v317_v58, %v875_v18  ;;  %v331_v27 = vmul.f32 %v317_v58, %v196_v23  ;;  %v332_v10 = vmul.f32 %v317_v58, %v197_v24  ;;  %v333_v11 = vadd.f32 %v319_v3, %v877_v19 }
  0xcb   : > { %v334_v12 = vadd.f32 %v320_v4, %v879_v20  ;;  %v335_v28 = vadd.f32 %v321_v5, %v272_v52  ;;  %v336_v13 = vadd.f32 %v322_v14, %v273_v53  ;;  %v337_v15 = vadd.f32 %v323_v21, %v274_v54 }
  0xcc   : > { %v338_v16 = vadd.f32 %v324_v22, %v275_v55  ;;  %v339_v17 = vadd.f32 %v325_v25, %v276_v56  ;;  %v340_v18 = vadd.f32 %v326_v26, %v277_v57  ;;  %v341_v29 = vadd.f32 %v327_v6, %v278_v59  ;;  %347 = vst [vmem:[%s901_s18] sm:$0xff] %v333_v11 }
  0xcd   : > { %v342_v23 = vadd.f32 %v328_v7, %v279_v60  ;;  %348 = vst [vmem:[%s901_s18 + $0x8] sm:$0xff] %v334_v12  ;;  %v343_v19 = vadd.f32 %v329_v8, %v280_v61  ;;  %v344_v20 = vadd.f32 %v330_v9, %v281_v62  ;;  %v345_v24 = vadd.f32 %v331_v27, %v282_v63 }
  0xce   : > { %v346_v30 = vadd.f32 %v332_v10, %v283_v0  ;;  %349 = vst [vmem:[%s901_s18 + $0x10] sm:$0xff] %v335_v28  ;;  %350 = vst [vmem:[%s901_s18 + $0x18] sm:$0xff] %v336_v13 }
  0xcf   : > { %351 = vst [vmem:[%s901_s18 + $0x20] sm:$0xff] %v337_v15  ;;  %352 = vst [vmem:[%s901_s18 + $0x28] sm:$0xff] %v338_v16 }
  0xd0   : > { %353 = vst [vmem:[%s901_s18 + $0x30] sm:$0xff] %v339_v17  ;;  %354 = vst [vmem:[%s901_s18 + $0x38] sm:$0xff] %v340_v18 }
  0xd1   : > { %355 = vst [vmem:[%s901_s18 + $0x40] sm:$0xff] %v341_v29  ;;  %356 = vst [vmem:[%s901_s18 + $0x48] sm:$0xff] %v342_v23 }
  0xd2   : > { %357 = vst [vmem:[%s901_s18 + $0x50] sm:$0xff] %v343_v19  ;;  %358 = vst [vmem:[%s901_s18 + $0x58] sm:$0xff] %v344_v20 }
  0xd3   : > { %359 = vst [vmem:[%s901_s18 + $0x60] sm:$0xff] %v345_v24  ;;  %360 = vst [vmem:[%s901_s18 + $0x68] sm:$0xff] %v346_v30 }
  0xd4   : > { %621 = shalt.err (!%p618_p5)
}
  0xd5   : > { %s622_s15 = scalar_lea.hbm %s922_s26, 2048  ;;  %s626_s5 = scalar_lea.hbm %s987_s2, 4096 }
  0xd6   : > { %p623_p4 = scmp.ne.s32.totalorder %s922_s26, %s622_s15  ;;  %p627_p12 = scmp.lt.u32.totalorder %s922_s26, %s987_s2 }
  0xd7   : > { %p628_p1 = scmp.lt.u32.totalorder %s626_s5, %s622_s15  ;;  %p630_p8 = scmp.lt.u32.totalorder %s622_s15, %s922_s26 }
  0xd8   : > { %p624_p7 = pnand %p623_p4, %p995_p9 }
  0xd9   : > { %p629_p3 = por %p628_p1, %p627_p12 }
  0xda   : > { %p625_p10 = pneg %p624_p7 }
  0xdb   : > { %p631_p11 = por %p630_p8, %p629_p3 }
  0xdd   : > { %p632_p0 = pnand %p631_p11, %p625_p10 }
  0xdf   : > { %635 = shalt.err (!%p632_p0)
}
  0xe0   : > { %s697_s16 = smov 256   ;;  %s698_s18 = smov 16  }
  0xe1   : > { %511 = dma.vmem_to_hbm [thread:$0]  (%p995_p9), %s924_s20, 2048, %s922_s26, %s362_s27, %s697_s16, %s697_s16, %s698_s18  }
  0xe2 PF: > { %s392_s19 = sand.u32 1, %s670_s9   ;;  %p996_p6 = scmp.ne.s32.totalorder %s992_s24, 0 }
  0xe3   : > { %p997_p13 = scmp.ge.s32.totalorder %s690_s14, 2  ;;  %s393_s12 = scalar_lea.sflag [#allocation4], %s392_s19 }
  0xe5   : > { %p518_p2 = pnand %p997_p13, %p996_p6 }
  0xe7   : > { %665 = dma.done.wait (!%p518_p2), %s393_s12, 2048  }
  0xe8   : > { %667 = vsyncadd (!%p518_p2), %s393_s12, 4294965248  ;;  %s18_s14 = sadd.s32 1, %s690_s14   ;;  %s998_s9 = smov %s674_s10 }
  0xe9   : > { %p15_p5 = scmp.ge.s32.totalorder %s18_s14, 4   ;;  %s999_s10 = smov %s678_s11 }
  0xea   : > { %s1000_s11 = smov %s770_s23  ;;  %s1001_s12 = smov %s686_s13 }
  0xeb   : > { %s1002_s13 = smov %s1004_s17  ;;  %17 = sbr.rel (!%p15_p5) target bundleno = 6 (0x6), region = 74 }
  0xf2   :  { %398 = vsyncpa [#allocation3], 1 }
  0xf3   :  { %400 = vsyncpa [#allocation3 + $0x1], 1 }
  0xf4   :  { %401 = vsyncpa [#allocation4], 1 }
  0xf5   :  { %403 = vsyncpa [#allocation4 + $0x1], 1 }

</bundles_post_ra>
